<compile_context>
chip_gen: v6e
topology: v6e:2x2x1
jax: 0.10.0
libtpu: 0.0.40
codegen_flags: <defaults>
</compile_context>

<pallas_src>
import functools

import jax
import jax.numpy as jnp
from jax.experimental import pallas as pl
from jax.experimental.pallas import tpu as pltpu

IN_FEATURES = 2
HIDDEN = (128, 64, 32)
OUT_FEATURES = 1


def _round_up(n, m):
    return ((n + m - 1) // m) * m


def _mlp_kernel(x_ref,
                w1_ref, b1_ref,
                w2_ref, b2_ref,
                w3_ref, b3_ref,
                w4_ref, b4_ref,
                o_ref):
    # Feature-major: x_ref is [2, TB]; activations are [features, TB].
    x = x_ref[...]                        # [2, TB]   f32
    w1 = w1_ref[...]                      # [128, 2]  f32

    # Layer 1 (K=2): two VPU broadcast FMAs instead of a degenerate MXU matmul
    # that would waste >98% of the systolic contraction depth.
    h = (w1[:, 0:1] * x[0:1, :] + w1[:, 1:2] * x[1:2, :]) + b1_ref[...]
    h = jnp.maximum(h, 0.0)               # [128, TB] f32

    # Layers 2/3: MXU matmuls with bf16 operands + f32 accumulation.  Bias add
    # and ReLU stay f32 on the VPU.
    h = jnp.dot(w2_ref[...], h.astype(jnp.bfloat16),
                preferred_element_type=jnp.float32) + b2_ref[...]
    h = jnp.maximum(h, 0.0)               # [64, TB]  f32

    h = jnp.dot(w3_ref[...], h.astype(jnp.bfloat16),
                preferred_element_type=jnp.float32) + b3_ref[...]
    h = jnp.maximum(h, 0.0)               # [32, TB]  f32

    # Layer 4 (N=1): elementwise multiply + sublane (XLU) reduction instead of
    # an MXU matmul with a 1-wide output.
    logits = jnp.sum(w4_ref[...] * h, axis=0, keepdims=True) + b4_ref[...]  # [1, TB]

    # Exact sigmoid: the logits tile is only [1, TB], so the EUP exp + f32
    # divide are unmeasurable; exp(-x) -> inf for very negative x still gives
    # exactly 0 (no approx-reciprocal edge case).
    o_ref[...] = (1.0 / (1.0 + jnp.exp(-logits))).astype(o_ref.dtype)


@functools.partial(jax.jit, static_argnames=("block_batch",))
def mlp_forward(x, params, *, block_batch=4096):
    """x: [batch, 2] float32 -> [batch, 1] float32.

    Parameter layout (PyTorch [out, in] orientation, column biases):
      w1 [128, 2],  b1 [128, 1]
      w2 [64, 128], b2 [64, 1]
      w3 [32, 64],  b3 [32, 1]
      w4 [32, 1],   b4 [1, 1]    (w4 stored transposed for the reduction)
    """
    batch = x.shape[0]
    padded128 = _round_up(max(batch, 1), 128)
    cap = max(128, _round_up(min(block_batch, padded128), 128))
    # v7x has 2 TensorCores; make sure the parallel grid axis has >= 2 tiles
    # whenever the batch allows it so the second core isn't idle.  Harmless on
    # single-core v5e/v6e.
    half = _round_up(pl.cdiv(padded128, 2), 128)
    tb = max(128, min(cap, half))
    padded = _round_up(padded128, tb)
    num_tiles = padded // tb

    # Feature-major, zero-padded input: batch on the 128-lane axis.
    xt = jnp.pad(x.astype(jnp.float32).T, ((0, 0), (0, padded - batch)))

    weight_args = (
        params["w1"].astype(jnp.float32), params["b1"].astype(jnp.float32),
        params["w2"].astype(jnp.bfloat16), params["b2"].astype(jnp.float32),
        params["w3"].astype(jnp.bfloat16), params["b3"].astype(jnp.float32),
        params["w4"].astype(jnp.float32), params["b4"].astype(jnp.float32),
    )

    def resident(a):
        # Whole array as one block with a constant index_map: Pallas keeps it
        # resident in VMEM across all batch tiles (only x/out stream).
        # Default double-buffering of these ~40 KB is left as-is; the saving
        # from single-buffering is negligible against the VMEM budget.
        return pl.BlockSpec(a.shape, lambda i: (0, 0))

    param_bytes = sum(int(a.size) * a.dtype.itemsize for a in weight_args)
    flops_per_row = 2 * (IN_FEATURES * HIDDEN[0] + HIDDEN[0] * HIDDEN[1]
                         + HIDDEN[1] * HIDDEN[2] + HIDDEN[2] * OUT_FEATURES)
    cost = pl.CostEstimate(
        flops=int(padded * flops_per_row),
        transcendentals=int(padded),  # one exp per row
        bytes_accessed=int(padded * (IN_FEATURES + OUT_FEATURES) * 4 + param_bytes),
    )

    out_t = pl.pallas_call(
        _mlp_kernel,
        out_shape=jax.ShapeDtypeStruct((OUT_FEATURES, padded), jnp.float32),
        grid=(num_tiles,),
        in_specs=[pl.BlockSpec((IN_FEATURES, tb), lambda i: (0, i))]
                 + [resident(a) for a in weight_args],
        out_specs=pl.BlockSpec((OUT_FEATURES, tb), lambda i: (0, i)),
        compiler_params=pltpu.CompilerParams(
            dimension_semantics=("parallel",),      # megacore sharding on v7x
            # 32 MiB: >= the ~6 MB per-tile working set at TB=4096; raises the
            # v5e 16 MiB scoped default and is <= the v6e/v7x defaults.
            vmem_limit_bytes=32 * 1024 * 1024,
            # Allow XLA to fuse the transpose/pad producer into operand 0 so x
            # isn't round-tripped through HBM just to relayout.
            allow_input_fusion=[True] + [False] * len(weight_args),
        ),
        cost_estimate=cost,
    )(xt, *weight_args)

    # Back to the module's [batch, 1] row-major output.
    return out_t[:, :batch].T


def init_params(key):
    """Deterministic uniform init, roughly PyTorch's default Linear range."""
    dims = (IN_FEATURES,) + HIDDEN + (OUT_FEATURES,)
    params = {}
    keys = jax.random.split(key, 2 * (len(dims) - 1))
    for layer in range(len(dims) - 1):
        fan_in, fan_out = dims[layer], dims[layer + 1]
        bound = 1.0 / float(fan_in) ** 0.5
        wk, bk = keys[2 * layer], keys[2 * layer + 1]
        params[f"w{layer + 1}"] = jax.random.uniform(
            wk, (fan_out, fan_in), jnp.float32, minval=-bound, maxval=bound)
        params[f"b{layer + 1}"] = jax.random.uniform(
            bk, (fan_out, 1), jnp.float32, minval=-bound, maxval=bound)
    # Final projection stored as [in, 1] so the kernel can do a multiply +
    # sublane reduction instead of an N=1 MXU matmul.
    params["w4"] = params["w4"].T
    return params


def reference_forward(x, params):
    """Plain-JAX f32 reference with identical math (exact sigmoid)."""
    h = jnp.maximum(x @ params["w1"].T + params["b1"].T, 0.0)
    h = jnp.maximum(h @ params["w2"].T + params["b2"].T, 0.0)
    h = jnp.maximum(h @ params["w3"].T + params["b3"].T, 0.0)
    logits = h @ params["w4"] + params["b4"].T
    return jax.nn.sigmoid(logits)


if __name__ == "__main__":
    key = jax.random.PRNGKey(0)
    pkey, xkey1, xkey2 = jax.random.split(key, 3)
    params = init_params(pkey)

    # Small shape consistent with the module's (batch, 2) input.
    x_small = jax.random.normal(xkey1, (8, IN_FEATURES), jnp.float32)
    out_small = mlp_forward(x_small, params)
    jax.block_until_ready(out_small)
    ref_small = reference_forward(x_small, params)
    assert out_small.shape == (8, OUT_FEATURES)
    # Tolerance covers bf16 MXU operands (f32 accumulation) in layers 2/3;
    # the sigmoid itself is exact.
    assert jnp.allclose(out_small, ref_small, atol=1e-2, rtol=1e-2), (
        float(jnp.max(jnp.abs(out_small - ref_small))))

    # Larger non-multiple-of-tile batch: exercises padding, the >=2-tile grid
    # split (v7x megacore path), and multi-tile pipelining.
    x_big = jax.random.normal(xkey2, (1000, IN_FEATURES), jnp.float32)
    out_big = mlp_forward(x_big, params)
    jax.block_until_ready(out_big)
    ref_big = reference_forward(x_big, params)
    assert out_big.shape == (1000, OUT_FEATURES)
    assert jnp.allclose(out_big, ref_big, atol=1e-2, rtol=1e-2), (
        float(jnp.max(jnp.abs(out_big - ref_big))))

    print("KERNEL_OK")
</pallas_src>

<mosaic_0001>
module attributes {stable_mosaic.version = 11 : i64} {
  func.func @_mlp_kernel(%arg0: i32, %arg1: memref<2x128xf32, #tpu.memory_space<vmem>>, %arg2: memref<128x2xf32, #tpu.memory_space<vmem>>, %arg3: memref<128x1xf32, #tpu.memory_space<vmem>>, %arg4: memref<64x128xbf16, #tpu.memory_space<vmem>>, %arg5: memref<64x1xf32, #tpu.memory_space<vmem>>, %arg6: memref<32x64xbf16, #tpu.memory_space<vmem>>, %arg7: memref<32x1xf32, #tpu.memory_space<vmem>>, %arg8: memref<32x1xf32, #tpu.memory_space<vmem>>, %arg9: memref<1x1xf32, #tpu.memory_space<vmem>>, %arg10: memref<1x128xf32, #tpu.memory_space<vmem>>) attributes {dimension_semantics = [#tpu.dimension_semantics<parallel>], iteration_bounds = array<i64: 1>, scalar_prefetch = 0 : i64, scratch_operands = 0 : i64, tpu.core_type = #tpu.core_type<tc>, window_params = [{transform_indices = @transform_0, window_bounds = array<i64: 2, 128>}, {pipeline_mode = #tpu.pipeline_mode<synchronous>, transform_indices = @transform_1, window_bounds = array<i64: 128, 2>}, {pipeline_mode = #tpu.pipeline_mode<synchronous>, transform_indices = @transform_2, window_bounds = array<i64: 128, 1>}, {pipeline_mode = #tpu.pipeline_mode<synchronous>, transform_indices = @transform_3, window_bounds = array<i64: 64, 128>}, {pipeline_mode = #tpu.pipeline_mode<synchronous>, transform_indices = @transform_4, window_bounds = array<i64: 64, 1>}, {pipeline_mode = #tpu.pipeline_mode<synchronous>, transform_indices = @transform_5, window_bounds = array<i64: 32, 64>}, {pipeline_mode = #tpu.pipeline_mode<synchronous>, transform_indices = @transform_6, window_bounds = array<i64: 32, 1>}, {pipeline_mode = #tpu.pipeline_mode<synchronous>, transform_indices = @transform_7, window_bounds = array<i64: 32, 1>}, {pipeline_mode = #tpu.pipeline_mode<synchronous>, transform_indices = @transform_8, window_bounds = array<i64: 1, 1>}, {transform_indices = @transform_9, window_bounds = array<i64: 1, 128>}]} {
    %c0 = arith.constant 0 : index
    %c0_0 = arith.constant 0 : index
    %0 = vector.load %arg1[%c0, %c0_0] : memref<2x128xf32, #tpu.memory_space<vmem>>, vector<2x128xf32>
    %c0_1 = arith.constant 0 : index
    %c0_2 = arith.constant 0 : index
    %1 = vector.load %arg2[%c0_1, %c0_2] : memref<128x2xf32, #tpu.memory_space<vmem>>, vector<128x2xf32>
    %2 = vector.extract_strided_slice %1 {offsets = [0, 0], sizes = [128, 1], strides = [1, 1]} : vector<128x2xf32> to vector<128x1xf32>
    %3 = vector.extract_strided_slice %0 {offsets = [0, 0], sizes = [1, 128], strides = [1, 1]} : vector<2x128xf32> to vector<1x128xf32>
    %4 = vector.broadcast %2 : vector<128x1xf32> to vector<128x128xf32>
    %5 = vector.broadcast %3 : vector<1x128xf32> to vector<128x128xf32>
    %6 = arith.mulf %4, %5 : vector<128x128xf32>
    %7 = vector.extract_strided_slice %1 {offsets = [0, 1], sizes = [128, 1], strides = [1, 1]} : vector<128x2xf32> to vector<128x1xf32>
    %8 = vector.extract_strided_slice %0 {offsets = [1, 0], sizes = [1, 128], strides = [1, 1]} : vector<2x128xf32> to vector<1x128xf32>
    %9 = vector.broadcast %7 : vector<128x1xf32> to vector<128x128xf32>
    %10 = vector.broadcast %8 : vector<1x128xf32> to vector<128x128xf32>
    %11 = arith.mulf %9, %10 : vector<128x128xf32>
    %12 = arith.addf %6, %11 : vector<128x128xf32>
    %c0_3 = arith.constant 0 : index
    %c0_4 = arith.constant 0 : index
    %13 = vector.load %arg3[%c0_3, %c0_4] : memref<128x1xf32, #tpu.memory_space<vmem>>, vector<128x1xf32>
    %14 = vector.broadcast %13 : vector<128x1xf32> to vector<128x128xf32>
    %15 = arith.addf %12, %14 : vector<128x128xf32>
    %cst = arith.constant 0.000000e+00 : f32
    %16 = vector.broadcast %cst : f32 to vector<128x128xf32>
    %17 = arith.maximumf %15, %16 : vector<128x128xf32>
    %c0_5 = arith.constant 0 : index
    %c0_6 = arith.constant 0 : index
    %18 = vector.load %arg4[%c0_5, %c0_6] : memref<64x128xbf16, #tpu.memory_space<vmem>>, vector<64x128xbf16>
    %19 = arith.truncf %17 : vector<128x128xf32> to vector<128x128xbf16>
    %cst_7 = arith.constant dense<0.000000e+00> : vector<64x128xf32>
    %20 = tpu.matmul %18, %19, %cst_7 {dimension_numbers = #tpu.dot_dimension_numbers<[1], [0], [0], [1], [0, 0, 1, 1], [], []>} : vector<64x128xbf16>, vector<128x128xbf16>, vector<64x128xf32> -> vector<64x128xf32>
    %c0_8 = arith.constant 0 : index
    %c0_9 = arith.constant 0 : index
    %21 = vector.load %arg5[%c0_8, %c0_9] : memref<64x1xf32, #tpu.memory_space<vmem>>, vector<64x1xf32>
    %22 = vector.broadcast %21 : vector<64x1xf32> to vector<64x128xf32>
    %23 = arith.addf %20, %22 : vector<64x128xf32>
    %cst_10 = arith.constant 0.000000e+00 : f32
    %24 = vector.broadcast %cst_10 : f32 to vector<64x128xf32>
    %25 = arith.maximumf %23, %24 : vector<64x128xf32>
    %c0_11 = arith.constant 0 : index
    %c0_12 = arith.constant 0 : index
    %26 = vector.load %arg6[%c0_11, %c0_12] : memref<32x64xbf16, #tpu.memory_space<vmem>>, vector<32x64xbf16>
    %27 = arith.truncf %25 : vector<64x128xf32> to vector<64x128xbf16>
    %cst_13 = arith.constant dense<0.000000e+00> : vector<32x128xf32>
    %28 = tpu.matmul %26, %27, %cst_13 {dimension_numbers = #tpu.dot_dimension_numbers<[1], [0], [0], [1], [0, 0, 1, 1], [], []>} : vector<32x64xbf16>, vector<64x128xbf16>, vector<32x128xf32> -> vector<32x128xf32>
    %c0_14 = arith.constant 0 : index
    %c0_15 = arith.constant 0 : index
    %29 = vector.load %arg7[%c0_14, %c0_15] : memref<32x1xf32, #tpu.memory_space<vmem>>, vector<32x1xf32>
    %30 = vector.broadcast %29 : vector<32x1xf32> to vector<32x128xf32>
    %31 = arith.addf %28, %30 : vector<32x128xf32>
    %cst_16 = arith.constant 0.000000e+00 : f32
    %32 = vector.broadcast %cst_16 : f32 to vector<32x128xf32>
    %33 = arith.maximumf %31, %32 : vector<32x128xf32>
    %c0_17 = arith.constant 0 : index
    %c0_18 = arith.constant 0 : index
    %34 = vector.load %arg8[%c0_17, %c0_18] : memref<32x1xf32, #tpu.memory_space<vmem>>, vector<32x1xf32>
    %35 = vector.broadcast %34 : vector<32x1xf32> to vector<32x128xf32>
    %36 = arith.mulf %35, %33 : vector<32x128xf32>
    %cst_19 = arith.constant dense<0.000000e+00> : vector<128xf32>
    %37 = vector.multi_reduction <add>, %36, %cst_19 [0] : vector<32x128xf32> to vector<128xf32>
    %38 = vector.shape_cast %37 : vector<128xf32> to vector<1x128xf32>
    %c0_20 = arith.constant 0 : index
    %c0_21 = arith.constant 0 : index
    %39 = vector.load %arg9[%c0_20, %c0_21] : memref<1x1xf32, #tpu.memory_space<vmem>>, vector<1x1xf32>
    %40 = vector.broadcast %39 : vector<1x1xf32> to vector<1x128xf32>
    %41 = arith.addf %38, %40 : vector<1x128xf32>
    %cst_22 = arith.constant 0.000000e+00 : f32
    %42 = vector.broadcast %cst_22 : f32 to vector<1x128xf32>
    %43 = arith.subf %42, %41 : vector<1x128xf32>
    %44 = math.exp %43 : vector<1x128xf32>
    %cst_23 = arith.constant 1.000000e+00 : f32
    %45 = vector.broadcast %cst_23 : f32 to vector<1x128xf32>
    %46 = arith.addf %45, %44 : vector<1x128xf32>
    %cst_24 = arith.constant 1.000000e+00 : f32
    %47 = vector.broadcast %cst_24 : f32 to vector<1x128xf32>
    %48 = arith.divf %47, %46 : vector<1x128xf32>
    %c0_25 = arith.constant 0 : index
    %c0_26 = arith.constant 0 : index
    %49 = vector.load %arg10[%c0_25, %c0_26] : memref<1x128xf32, #tpu.memory_space<vmem>>, vector<1x128xf32>
    tpu.vector_store %arg10[%c0_25, %c0_26], %48 {strides = array<i32>} : memref<1x128xf32, #tpu.memory_space<vmem>>, vector<1x128xf32>,
    return
  }
  func.func @transform_0(%arg0: i32) -> (i32, i32) {
    %c0_i32 = arith.constant 0 : i32
    %c0_i32_0 = arith.constant 0 : i32
    return %c0_i32, %arg0 : i32, i32
  }
  func.func @transform_1(%arg0: i32) -> (i32, i32) {
    %c0_i32 = arith.constant 0 : i32
    %c0_i32_0 = arith.constant 0 : i32
    %c0_i32_1 = arith.constant 0 : i32
    return %c0_i32, %c0_i32_0 : i32, i32
  }
  func.func @transform_2(%arg0: i32) -> (i32, i32) {
    %c0_i32 = arith.constant 0 : i32
    %c0_i32_0 = arith.constant 0 : i32
    %c0_i32_1 = arith.constant 0 : i32
    return %c0_i32, %c0_i32_0 : i32, i32
  }
  func.func @transform_3(%arg0: i32) -> (i32, i32) {
    %c0_i32 = arith.constant 0 : i32
    %c0_i32_0 = arith.constant 0 : i32
    %c0_i32_1 = arith.constant 0 : i32
    return %c0_i32, %c0_i32_0 : i32, i32
  }
  func.func @transform_4(%arg0: i32) -> (i32, i32) {
    %c0_i32 = arith.constant 0 : i32
    %c0_i32_0 = arith.constant 0 : i32
    %c0_i32_1 = arith.constant 0 : i32
    return %c0_i32, %c0_i32_0 : i32, i32
  }
  func.func @transform_5(%arg0: i32) -> (i32, i32) {
    %c0_i32 = arith.constant 0 : i32
    %c0_i32_0 = arith.constant 0 : i32
    %c0_i32_1 = arith.constant 0 : i32
    return %c0_i32, %c0_i32_0 : i32, i32
  }
  func.func @transform_6(%arg0: i32) -> (i32, i32) {
    %c0_i32 = arith.constant 0 : i32
    %c0_i32_0 = arith.constant 0 : i32
    %c0_i32_1 = arith.constant 0 : i32
    return %c0_i32, %c0_i32_0 : i32, i32
  }
  func.func @transform_7(%arg0: i32) -> (i32, i32) {
    %c0_i32 = arith.constant 0 : i32
    %c0_i32_0 = arith.constant 0 : i32
    %c0_i32_1 = arith.constant 0 : i32
    return %c0_i32, %c0_i32_0 : i32, i32
  }
  func.func @transform_8(%arg0: i32) -> (i32, i32) {
    %c0_i32 = arith.constant 0 : i32
    %c0_i32_0 = arith.constant 0 : i32
    %c0_i32_1 = arith.constant 0 : i32
    return %c0_i32, %c0_i32_0 : i32, i32
  }
  func.func @transform_9(%arg0: i32) -> (i32, i32) {
    %c0_i32 = arith.constant 0 : i32
    %c0_i32_0 = arith.constant 0 : i32
    return %c0_i32, %arg0 : i32, i32
  }
}

</mosaic_0001>

<bundles_post_ra>
// kernel: mlp_forward.2
= control target key start
LH: loop header
LB: loop body
LE: loop exit
PB: predicated region body
PF: predicated region fallthrough
CT: control target
= control target key end

     0   :  { %s1132_s0 = inlined_call_operand.vmem [shape: f32[128,2], index: 0, kind: input, shape index: {}]   ;;  %s1133_s1 = inlined_call_operand.vmem [shape: f32[128,1], index: 1, kind: input, shape index: {}]   ;;  %s1134_s2 = inlined_call_operand.vmem [shape: bf16[64,128], index: 2, kind: input, shape index: {}]   ;;  %s1135_s3 = inlined_call_operand.vmem [shape: f32[64,1], index: 3, kind: input, shape index: {}]   ;;  %s1136_s4 = inlined_call_operand.vmem [shape: bf16[32,64], index: 4, kind: input, shape index: {}]   ;;  %s1137_s5 = inlined_call_operand.vmem [shape: f32[32,1], index: 5, kind: input, shape index: {}]   ;;  %s1138_s6 = inlined_call_operand.vmem [shape: f32[32,1], index: 6, kind: input, shape index: {}]   ;;  %s1139_s7 = inlined_call_operand.<no memory space> [shape: f32[1,1], index: 7, kind: input, shape index: {}]   ;;  %s1140_s8 = inlined_call_operand.vmem [shape: f32[2,8], index: 8, kind: input, shape index: {}]   ;;  %s1141_s9 = inlined_call_operand.<no memory space> [shape: f32[], index: 9, kind: input, shape index: {}]   ;;  %s1142_s10 = inlined_call_operand.vmem [shape: f32[1,128], index: 10, kind: output, shape index: {}]  }
   0x1   :  { %v15_v0 = vstv %s1141_s9  ;;  %v16_v1 = vstv %s1139_s7 }
   0x2   :  { %17 = vst [vmem:[#allocation7] sm:$0x1] %v16_v1 }
   0x3   :  { %v66_v2 = vld [vmem:[%s1132_s0 + $0x70] sm:$0xff]  ;;  %v64_v3 = vld [vmem:[%s1132_s0 + $0x60] sm:$0xff]  ;;  %v810_v4 = vmov 1   ;;  %v37_v5 = vlaneseq  ;;  %v67_v6 = vld [vmem:[%s1132_s0 + $0x78] sm:$0xff]  ;;  %v811_v12 = vmov 0   ;;  %vm599_vm2 = vcmask 523264  }
   0x4   :  { %784 = vset.pattern.permute.xlu0 %v810_v4  ;;  %782 = vset.pattern.permute.xlu1 %v810_v4  ;;  %v62_v7 = vld [vmem:[%s1132_s0 + $0x50] sm:$0xff]  ;;  %v60_v9 = vld [vmem:[%s1132_s0 + $0x40] sm:$0xff]  ;;  %v65_v11 = vld [vmem:[%s1132_s0 + $0x68] sm:$0xff] }
   0x5   :  { %225 = vperm.xlu1 %782, %v66_v2   ;;  %217 = vperm.xlu0 %784, %v64_v3   ;;  %v887_v8 = vshrl.u32 %v37_v5, 7  ;;  %v43_v10 = vand.u32 127, %v37_v5  ;;  %v58_v13 = vld [vmem:[%s1132_s0 + $0x30] sm:$0xff]  ;;  %v36_v14 = vld [vmem:[%s1140_s8] sm:$0x3]  ;;  %v63_v21 = vld [vmem:[%s1132_s0 + $0x58] sm:$0xff] }
   0x6   :  { %v56_v16 = vld [vmem:[%s1132_s0 + $0x20] sm:$0xff]  ;;  %v282_v18 = vld [vmem:[%s1133_s1 + $0x70] sm:$0xff]  ;;  %v283_v23 = vld [vmem:[%s1133_s1 + $0x78] sm:$0xff] }
   0x7   :  { %vm40_vm0 = vcmp.lt.s32.totalorder %v887_v8, 2  ;;  %vm45_vm1 = vcmp.lt.s32.totalorder %v43_v10, 8  ;;  %v913_v19 = vld [vmem:[%s1132_s0 + $0x10] sm:$0xff]  ;;  %v920_v20 = vld [vmem:[%s1132_s0] sm:$0xff]  ;;  %v61_v24 = vld [vmem:[%s1132_s0 + $0x48] sm:$0xff]  ;;  %v234_v5 = vsub.s32 1, %v887_v8 }
   0x8   :  { %v41_v15 = vsel %vm40_vm0, %v36_v14, %v15_v0  ;;  %v280_v22 = vld [vmem:[%s1133_s1 + $0x60] sm:$0xff]  ;;  %v281_v25 = vld [vmem:[%s1133_s1 + $0x68] sm:$0xff]  ;;  %v279_v26 = vld [vmem:[%s1133_s1 + $0x58] sm:$0xff] }
   0x9   :  { %229 = vperm.xlu1 %782, %v67_v6   ;;  %209 = vperm.xlu0 %784, %v62_v7   ;;  %v46_v17 = vsel %vm45_vm1, %v41_v15, %v15_v0  ;;  %v277_v27 = vld [vmem:[%s1133_s1 + $0x48] sm:$0xff]  ;;  %v278_v28 = vld [vmem:[%s1133_s1 + $0x50] sm:$0xff]  ;;  %v275_v29 = vld [vmem:[%s1133_s1 + $0x38] sm:$0xff] }
   0xa   :  { %49 = vst [vmem:[#allocation8] sm:$0x3] %v46_v17  ;;  %v273_v30 = vld [vmem:[%s1133_s1 + $0x28] sm:$0xff]  ;;  %v59_v31 = vld [vmem:[%s1132_s0 + $0x38] sm:$0xff]  ;;  %v418_v33 = vld [vmem:[%s1135_s3 + $0x30] sm:$0xff] }
   0xb   :  { %v271_v32 = vld [vmem:[%s1133_s1 + $0x18] sm:$0xff]  ;;  %v276_v34 = vld [vmem:[%s1133_s1 + $0x40] sm:$0xff]  ;;  %v414_v36 = vld [vmem:[%s1135_s3 + $0x10] sm:$0xff] }
   0xc   :  { %v416_v35 = vld [vmem:[%s1135_s3 + $0x20] sm:$0xff]  ;;  %v57_v37 = vld [vmem:[%s1132_s0 + $0x28] sm:$0xff]  ;;  %v567_v40 = vld [vmem:[%s1137_s5 + $0x10] sm:$0xff] }
   0xd   :  { %783 = vset.pattern.permute.xlu1 %v811_v12  ;;  %201 = vperm.xlu0 %784, %v60_v9   ;;  %v412_v38 = vld [vmem:[%s1135_s3] sm:$0xff]  ;;  %v274_v41 = vld [vmem:[%s1133_s1 + $0x30] sm:$0xff]  ;;  %v55_v44 = vld [vmem:[%s1132_s0 + $0x18] sm:$0xff] }
   0xe   :  { %135 = vperm.xlu1 %783, %v65_v11   ;;  %v565_v39 = vld [vmem:[%s1137_s5] sm:$0xff]  ;;  %v661_v43 = vld [vmem:[%s1138_s6 + $0x10] sm:$0xff]  ;;  %v53_v47 = vld [vmem:[%s1132_s0 + $0x8] sm:$0xff] }
   0xf   :  { %v659_v42 = vld [vmem:[%s1138_s6] sm:$0xff]  ;;  %v270_v50 = vld [vmem:[%s1133_s1 + $0x10] sm:$0xff]  ;;  %v269_v56 = vld [vmem:[%s1133_s1 + $0x8] sm:$0xff] }
  0x10   :  { %v696_v45 = vld [vmem:[#allocation7] sm:$0x1]  ;;  %v419_v58 = vld [vmem:[%s1135_s3 + $0x38] sm:$0xff]  ;;  %v417_v62 = vld [vmem:[%s1135_s3 + $0x28] sm:$0xff] }
  0x11   :  { %193 = vperm.xlu0 %784, %v58_v13   ;;  %v272_v46 = vld [vmem:[%s1133_s1 + $0x20] sm:$0xff]  ;;  %v415_v1 = vld [vmem:[%s1135_s3 + $0x18] sm:$0xff] }
  0x12   :  { %785 = vset.pattern.permute.xlu1 %v810_v4  ;;  %v268_v53 = vld [vmem:[%s1133_s1] sm:$0xff]  ;;  %v568_v17 = vld [vmem:[%s1137_s5 + $0x18] sm:$0xff] }
  0x13   :  { %221 = vperm.xlu1 %785, %v65_v11   ;;  %v800_v60 = vld [vmem:[%s1134_s2] sm:$0xff]   ;;  %v566_v11 = vld [vmem:[%s1137_s5 + $0x8] sm:$0xff] }
  0x14   :  { %760 = vmatprep.mubr.bf16.mxu0 %v800_v60 }
  0x15   :  { %185 = vperm.xlu0 %784, %v56_v16  }
  0x17   :  { %786 = vset.pattern.permute.xlu1 %v811_v12 }
  0x18   :  { %356 = vperm.xlu1 %786, %v282_v18  }
  0x19   :  { %177 = vperm.xlu0 %784, %v913_v19  }
  0x1c   :  { %120 = vperm.xlu1 %786, %v62_v7   ;;  %v51_v7 = vld [vmem:[#allocation8] sm:$0x3] }
  0x1d   :  { %169 = vperm.xlu0 %784, %v920_v20  }
  0x20   :  { %125 = vperm.xlu1 %786, %v63_v21  }
  0x21   :  { %797 = vset.pattern.permute.xlu0 %v811_v12 }
  0x22   :  { %140 = vperm.xlu0 %797, %v66_v2  }
  0x24   :  { %787 = vset.pattern.permute.xlu1 %v810_v4 }
  0x25   :  { %213 = vperm.xlu1 %787, %v63_v21  }
  0x26   :  { %145 = vperm.xlu0 %797, %v67_v6   ;;  %v150_v6 = vsub.s32 0, %v887_v8 }
  0x29   :  { %788 = vset.pattern.permute.xlu1 %v811_v12 }
  0x2a   :  { %346 = vperm.xlu1 %788, %v280_v22   ;;  %130 = vperm.xlu0 %797, %v64_v3  }
  0x2e   :  { %110 = vperm.xlu1 %788, %v60_v9   ;;  %361 = vperm.xlu0 %797, %v283_v23  }
  0x32   :  { %115 = vperm.xlu1 %788, %v61_v24   ;;  %351 = vperm.xlu0 %797, %v281_v25  }
  0x36   :  { %789 = vset.pattern.permute.xlu1 %v810_v4  ;;  %341 = vperm.xlu0 %797, %v279_v26  }
  0x37   :  { %205 = vperm.xlu1 %789, %v61_v24   ;;  %v660_v24 = vld [vmem:[%s1138_s6 + $0x8] sm:$0xff] }
  0x3a   :  { %331 = vperm.xlu0 %797, %v277_v27  }
  0x3b   :  { %790 = vset.pattern.permute.xlu1 %v811_v12 }
  0x3c   :  { %336 = vperm.xlu1 %790, %v278_v28  }
  0x3e   :  { %321 = vperm.xlu0 %797, %v275_v29  }
  0x40   :  { %100 = vperm.xlu1 %790, %v58_v13   ;;  %v1061_v13 = vrot.slane %v51_v7, %v150_v6 }
  0x42   :  { %311 = vperm.xlu0 %797, %v273_v30  }
  0x44   :  { %105 = vperm.xlu1 %790, %v59_v31  }
  0x46   :  { %301 = vperm.xlu0 %797, %v271_v32  }
  0x48   :  { %791 = vset.pattern.permute.xlu1 %v810_v4 }
  0x49   :  { %197 = vperm.xlu1 %791, %v59_v31  }
  0x4a   :  { %452 = vperm.xlu0 %797, %v418_v33   ;;  %v662_v33 = vld [vmem:[%s1138_s6 + $0x18] sm:$0xff] }
  0x4d   :  { %792 = vset.pattern.permute.xlu1 %v811_v12 }
  0x4e   :  { %326 = vperm.xlu1 %792, %v276_v34   ;;  %442 = vperm.xlu0 %797, %v416_v35  }
  0x52   :  { %90 = vperm.xlu1 %792, %v56_v16   ;;  %432 = vperm.xlu0 %797, %v414_v36  }
  0x56   :  { %95 = vperm.xlu1 %792, %v57_v37   ;;  %422 = vperm.xlu0 %797, %v412_v38  }
  0x5a   :  { %793 = vset.pattern.permute.xlu1 %v810_v4  ;;  %571 = vperm.xlu0 %797, %v565_v39  }
  0x5b   :  { %189 = vperm.xlu1 %793, %v57_v37  }
  0x5e   :  { %581 = vperm.xlu0 %797, %v567_v40  }
  0x5f   :  { %794 = vset.pattern.permute.xlu1 %v811_v12 }
  0x60   :  { %316 = vperm.xlu1 %794, %v274_v41  }
  0x62   :  { %665 = vperm.xlu0 %797, %v659_v42  }
  0x64   :  { %80 = vperm.xlu1 %794, %v913_v19  }
  0x66   :  { %675 = vperm.xlu0 %797, %v661_v43  }
  0x68   :  { %85 = vperm.xlu1 %794, %v55_v44  }
  0x6a   :  { %699 = vperm.xlu0 %797, %v696_v45  }
  0x6c   :  { %795 = vset.pattern.permute.xlu1 %v810_v4 }
  0x6d   :  { %181 = vperm.xlu1 %795, %v55_v44  }
  0x71   :  { %796 = vset.pattern.permute.xlu1 %v811_v12 }
  0x72   :  { %306 = vperm.xlu1 %796, %v272_v46  }
  0x76   :  { %70 = vperm.xlu1 %796, %v920_v20  }
  0x7a   :  { %75 = vperm.xlu1 %796, %v53_v47  }
  0x7e   :  { %798 = vset.pattern.permute.xlu1 %v810_v4  ;;  %v413_v4 = vld [vmem:[%s1135_s3 + $0x8] sm:$0xff] }
  0x7f   :  { %173 = vperm.xlu1 %798, %v53_v47  }
  0x80   :  { %v226_v48 = vpop.permute.xlu1 %225  ;;  %v218_v49 = vpop.permute.xlu0 %217 }
  0x83   :  { %799 = vset.pattern.permute.xlu1 %v811_v12  ;;  %v1057_v12 = vrot.slane %v51_v7, %v234_v5 }
  0x84   :  { %v230_v51 = vpop.permute.xlu1 %229  ;;  %296 = vperm.xlu1 %799, %v270_v50   ;;  %v1019_v52 = vpop.permute.xlu0 %209 }
  0x85   :  { %v250_v18 = vmul.f32 %v1057_v12, %v226_v48  ;;  %v248_v19 = vmul.f32 %v1057_v12, %v218_v49  ;;  %v251_v25 = vmul.f32 %v1057_v12, %v230_v51  ;;  %v246_v47 = vmul.f32 %v1057_v12, %v1019_v52 }
  0x88   :  { %286 = vperm.xlu1 %799, %v268_v53   ;;  %v1024_v54 = vpop.permute.xlu0 %201 }
  0x89   :  { %v136_v55 = vpop.permute.xlu1 %135  ;;  %v244_v7 = vmul.f32 %v1057_v12, %v1024_v54 }
  0x8a   :  { %v165_v34 = vmul.f32 %v1061_v13, %v136_v55 }
  0x8c   :  { %291 = vperm.xlu1 %799, %v269_v56   ;;  %v1029_v57 = vpop.permute.xlu0 %193 }
  0x8e   :  { %v222_v59 = vpop.permute.xlu1 %221 }
  0x8f   :  { %v249_v27 = vmul.f32 %v1057_v12, %v222_v59 }
  0x90   :  { %457 = vperm.xlu1 %799, %v419_v58   ;;  %v1037_v61 = vpop.permute.xlu0 %185 }
  0x91   :  { %v265_v38 = vadd.f32 %v249_v27, %v165_v34 }
  0x93   :  { %v357_v63 = vpop.permute.xlu1 %356 }
  0x94   :  { %447 = vperm.xlu1 %799, %v417_v62   ;;  %v1042_v0 = vpop.permute.xlu0 %177 }
  0x97   :  { %v121_v2 = vpop.permute.xlu1 %120 }
  0x98   :  { %437 = vperm.xlu1 %799, %v415_v1   ;;  %v1047_v3 = vpop.permute.xlu0 %169  ;;  %v162_v48 = vmul.f32 %v1061_v13, %v121_v2 }
  0x9a   :  { %v262_v58 = vadd.f32 %v246_v47, %v162_v48 }
  0x9b   :  { %v126_v9 = vpop.permute.xlu1 %125 }
  0x9c   :  { %427 = vperm.xlu1 %799, %v413_v4   ;;  %v163_v49 = vmul.f32 %v1061_v13, %v126_v9 }
  0x9d   :  { %v141_v10 = vpop.permute.xlu0 %140 }
  0x9e   :  { %v166_v14 = vmul.f32 %v1061_v13, %v141_v10 }
  0xa0   :  { %v214_v15 = vpop.permute.xlu1 %213  ;;  %576 = vperm.xlu1 %799, %v566_v11   ;;  %v266_v20 = vadd.f32 %v250_v18, %v166_v14 }
  0xa1   :  { %v146_v16 = vpop.permute.xlu0 %145  ;;  %v247_v44 = vmul.f32 %v1057_v12, %v214_v15 }
  0xa2   :  { %v167_v21 = vmul.f32 %v1061_v13, %v146_v16  ;;  %v378_v30 = vadd.f32 %v357_v63, %v266_v20 }
  0xa3   :  { %v263_v55 = vadd.f32 %v247_v44, %v163_v49 }
  0xa4   :  { %586 = vperm.xlu1 %799, %v568_v17   ;;  %v267_v29 = vadd.f32 %v251_v25, %v167_v21  ;;  %v394_v39 = vmax.f32 %v378_v30, 0.0  ;;  %v242_v25 = vmul.f32 %v1057_v12, %v1029_v57 }
  0xa5   :  { %v347_v22 = vpop.permute.xlu1 %346  ;;  %v131_v23 = vpop.permute.xlu0 %130 }
  0xa6   :  { %v164_v26 = vmul.f32 %v1061_v13, %v131_v23 }
  0xa8   :  { %v264_v28 = vadd.f32 %v248_v19, %v164_v26  ;;  %670 = vperm.xlu1 %799, %v660_v24  }
  0xa9   :  { %v111_v31 = vpop.permute.xlu1 %110  ;;  %v362_v32 = vpop.permute.xlu0 %361 }
  0xaa   :  { %v379_v35 = vadd.f32 %v362_v32, %v267_v29  ;;  %v376_v36 = vadd.f32 %v347_v22, %v264_v28  ;;  %v160_v9 = vmul.f32 %v1061_v13, %v111_v31 }
  0xac   :  { %v395_v37 = vmax.f32 %v379_v35, 0.0  ;;  %680 = vperm.xlu1 %799, %v662_v33   ;;  %v392_v45 = vmax.f32 %v376_v36, 0.0  ;;  %v260_v16 = vadd.f32 %v244_v7, %v160_v9  ;;  %v236_v7 = vmul.f32 %v1057_v12, %v1047_v3  ;;  %v801_v3 = vld [vmem:[%s1134_s2 + $0x8] sm:$0xff]  }
  0xad   :  { %v116_v40 = vpop.permute.xlu1 %115  ;;  %v352_v41 = vpop.permute.xlu0 %351 }
  0xae   :  { %v377_v42 = vadd.f32 %v352_v41, %v265_v38  ;;  %v411_v43 = vpack.c.bf16 %v395_v37, %v394_v39  ;;  %v161_v5 = vmul.f32 %v1061_v13, %v116_v40 }
  0xb0   :  { %v393_v46 = vmax.f32 %v377_v42, 0.0  ;;  %744 = vmatprep.subr.bf16.mxu0 %v411_v43 }
  0xb1   :  { %745 = vmatpush3.bf16.msra.mxu0 %v411_v43  ;;  %v342_v53 = vpop.permute.xlu0 %341  ;;  %v240_v43 = vmul.f32 %v1057_v12, %v1037_v61 }
  0xb2   :  { %v410_v50 = vpack.c.bf16 %v393_v46, %v392_v45  ;;  %v206_v51 = vpop.permute.xlu1 %205  ;;  %v375_v56 = vadd.f32 %v342_v53, %v263_v55 }
  0xb3   :  { %v245_v2 = vmul.f32 %v1057_v12, %v206_v51 }
  0xb4   :  { %746 = vmatprep.subr.bf16.mxu0 %v410_v50  ;;  %v391_v62 = vmax.f32 %v375_v56, 0.0 }
  0xb5   :  { %747 = vmatpush3.bf16.msra.mxu0 %v410_v50  ;;  %v261_v10 = vadd.f32 %v245_v2, %v161_v5  ;;  %v332_v14 = vpop.permute.xlu0 %331 }
  0xb7   :  { %v337_v59 = vpop.permute.xlu1 %336  ;;  %v373_v15 = vadd.f32 %v332_v14, %v261_v10 }
  0xb8   :  { %v374_v60 = vadd.f32 %v337_v59, %v262_v58 }
  0xb9   :  { %v389_v19 = vmax.f32 %v373_v15, 0.0  ;;  %v322_v29 = vpop.permute.xlu0 %321 }
  0xba   :  { %v390_v63 = vmax.f32 %v374_v60, 0.0 }
  0xbb   :  { %v101_v1 = vpop.permute.xlu1 %100 }
  0xbc   :  { %v409_v4 = vpack.c.bf16 %v391_v62, %v390_v63  ;;  %v158_v26 = vmul.f32 %v1061_v13, %v101_v1  ;;  %v238_v62 = vmul.f32 %v1057_v12, %v1042_v0 }
  0xbd   :  { %v312_v44 = vpop.permute.xlu0 %311 }
  0xbe   :  { %748 = vmatprep.subr.bf16.mxu0 %v409_v4  ;;  %v258_v31 = vadd.f32 %v242_v25, %v158_v26 }
  0xbf   :  { %v106_v52 = vpop.permute.xlu1 %105  ;;  %749 = vmatpush3.bf16.msra.mxu0 %v409_v4 }
  0xc0   :  { %v159_v54 = vmul.f32 %v1061_v13, %v106_v52 }
  0xc1   :  { %v302_v63 = vpop.permute.xlu0 %301 }
  0xc4   :  { %v198_v11 = vpop.permute.xlu1 %197 }
  0xc5   :  { %v243_v24 = vmul.f32 %v1057_v12, %v198_v11  ;;  %v453_v26 = vpop.permute.xlu0 %452 }
  0xc7   :  { %v259_v27 = vadd.f32 %v243_v24, %v159_v54  ;;  %v804_v24 = vld [vmem:[%s1136_s4] sm:$0xff]  }
  0xc8   :  { %776 = vmatprep.mubr.msk.bf16.mxu1 %vm599_vm2, %v804_v24 }
  0xc9   :  { %v327_v17 = vpop.permute.xlu1 %326  ;;  %v371_v30 = vadd.f32 %v322_v29, %v259_v27 }
  0xca   :  { %v372_v18 = vadd.f32 %v327_v17, %v260_v16 }
  0xcb   :  { %v387_v35 = vmax.f32 %v371_v30, 0.0 }
  0xcc   :  { %v388_v20 = vmax.f32 %v372_v18, 0.0 }
  0xcd   :  { %v91_v21 = vpop.permute.xlu1 %90 }
  0xce   :  { %v408_v22 = vpack.c.bf16 %v389_v19, %v388_v20  ;;  %v156_v40 = vmul.f32 %v1061_v13, %v91_v21 }
  0xd0   :  { %750 = vmatprep.subr.bf16.mxu0 %v408_v22  ;;  %v256_v46 = vadd.f32 %v240_v43, %v156_v40 }
  0xd1   :  { %v96_v23 = vpop.permute.xlu1 %95  ;;  %751 = vmatpush3.bf16.msra.mxu0 %v408_v22 }
  0xd2   :  { %v157_v57 = vmul.f32 %v1061_v13, %v96_v23 }
  0xd6   :  { %v190_v28 = vpop.permute.xlu1 %189 }
  0xd7   :  { %v241_v39 = vmul.f32 %v1057_v12, %v190_v28 }
  0xd9   :  { %v257_v41 = vadd.f32 %v241_v39, %v157_v57 }
  0xdb   :  { %v317_v32 = vpop.permute.xlu1 %316  ;;  %v369_v45 = vadd.f32 %v312_v44, %v257_v41 }
  0xdc   :  { %v370_v33 = vadd.f32 %v317_v32, %v258_v31  ;;  %v443_v31 = vpop.permute.xlu0 %442 }
  0xdd   :  { %v385_v50 = vmax.f32 %v369_v45, 0.0 }
  0xde   :  { %v386_v34 = vmax.f32 %v370_v33, 0.0 }
  0xdf   :  { %v81_v36 = vpop.permute.xlu1 %80 }
  0xe0   :  { %v407_v37 = vpack.c.bf16 %v387_v35, %v386_v34  ;;  %v154_v59 = vmul.f32 %v1061_v13, %v81_v36  ;;  %v433_v39 = vpop.permute.xlu0 %432 }
  0xe2   :  { %752 = vmatprep.subr.bf16.mxu0 %v407_v37  ;;  %v254_v4 = vadd.f32 %v238_v62, %v154_v59  ;;  %v805_v62 = vld [vmem:[%s1136_s4 + $0x8] sm:$0xff]  }
  0xe3   :  { %v86_v38 = vpop.permute.xlu1 %85  ;;  %753 = vmatpush3.bf16.msra.mxu0 %v407_v37 }
  0xe4   :  { %v155_v58 = vmul.f32 %v1061_v13, %v86_v38 }
  0xe8   :  { %v182_v42 = vpop.permute.xlu1 %181 }
  0xe9   :  { %v239_v56 = vmul.f32 %v1057_v12, %v182_v42 }
  0xeb   :  { %v255_v60 = vadd.f32 %v239_v56, %v155_v58 }
  0xed   :  { %v307_v47 = vpop.permute.xlu1 %306  ;;  %v367_v1 = vadd.f32 %v302_v63, %v255_v60 }
  0xee   :  { %v368_v48 = vadd.f32 %v307_v47, %v256_v46 }
  0xef   :  { %v383_v11 = vmax.f32 %v367_v1, 0.0 }
  0xf0   :  { %v384_v49 = vmax.f32 %v368_v48, 0.0 }
  0xf1   :  { %v71_v51 = vpop.permute.xlu1 %70 }
  0xf2   :  { %v406_v53 = vpack.c.bf16 %v385_v50, %v384_v49  ;;  %v152_v2 = vmul.f32 %v1061_v13, %v71_v51 }
  0xf4   :  { %754 = vmatprep.subr.bf16.mxu0 %v406_v53  ;;  %v252_v17 = vadd.f32 %v236_v7, %v152_v2 }
  0xf5   :  { %v76_v55 = vpop.permute.xlu1 %75  ;;  %755 = vmatpush3.bf16.msra.mxu0 %v406_v53  ;;  %v423_v53 = vpop.permute.xlu0 %422 }
  0xf6   :  { %v153_v15 = vmul.f32 %v1061_v13, %v76_v55  ;;  %v803_v13 = vld [vmem:[%s1134_s2 + $0x18] sm:$0xff]  }
  0xf9   :  { %v572_v63 = vpop.permute.xlu0 %571 }
  0xfa   :  { %v174_v61 = vpop.permute.xlu1 %173 }
  0xfb   :  { %v237_v9 = vmul.f32 %v1057_v12, %v174_v61  ;;  %v802_v12 = vld [vmem:[%s1134_s2 + $0x10] sm:$0xff]  }
  0xfd   :  { %v253_v18 = vadd.f32 %v237_v9, %v153_v15 }
  0xff   :  { %v297_v52 = vpop.permute.xlu1 %296 }
 0x100   :  { %v366_v5 = vadd.f32 %v297_v52, %v254_v4  ;;  %v582_v4 = vpop.permute.xlu0 %581 }
 0x102   :  { %v382_v10 = vmax.f32 %v366_v5, 0.0 }
 0x103   :  { %v287_v14 = vpop.permute.xlu1 %286 }
 0x104   :  { %v405_v16 = vpack.c.bf16 %v383_v11, %v382_v10  ;;  %v364_v0 = vadd.f32 %v287_v14, %v252_v17  ;;  %v666_v11 = vpop.permute.xlu0 %665 }
 0x106   :  { %756 = vmatprep.subr.bf16.mxu0 %v405_v16  ;;  %v380_v21 = vmax.f32 %v364_v0, 0.0 }
 0x107   :  { %v292_v19 = vpop.permute.xlu1 %291  ;;  %757 = vmatpush3.bf16.msra.mxu0 %v405_v16 }
 0x108   :  { %v365_v20 = vadd.f32 %v292_v19, %v253_v18 }
 0x10a   :  { %v381_v22 = vmax.f32 %v365_v20, 0.0 }
 0x10b   :  { %v458_v54 = vpop.permute.xlu1 %457 }
 0x10c   :  { %v404_v23 = vpack.c.bf16 %v381_v22, %v380_v21 }
 0x10e   :  { %758 = vmatprep.subr.bf16.mxu0 %v404_v23 }
 0x10f   :  { %759 = vmatpush3.bf16.msra.mxu0 %v404_v23  ;;  %v448_v29 = vpop.permute.xlu1 %447  ;;  %v676_v23 = vpop.permute.xlu0 %675 }
 0x112   :  { %761 = vmatmul.mubr.bf16.vlgmr.msra.gmra.mxu0 %v801_v3 }
 0x113   :  { %764 = vmatprep.mubr.bf16.mxu0 %v802_v12  ;;  %v438_v35 = vpop.permute.xlu1 %437 }
 0x117   :  { %v428_v48 = vpop.permute.xlu1 %427 }
 0x11a   :  { %765 = vmatmul.mubr.bf16.gmra.mxu0 %v803_v13 }
 0x11b   :  { %v577_v1 = vpop.permute.xlu1 %576 }
 0x11f   :  { %v587_v2 = vpop.permute.xlu1 %586 }
 0x123   :  { %v671_v0 = vpop.permute.xlu1 %670 }
 0x127   :  { %v681_v13 = vpop.permute.xlu1 %680 }
 0x1d2   :  { %v762_v25 = vpop.f32.mrf.mxu0 }
 0x1d3   :  { %v527_v44 = vadd.f32 %v762_v25, %v433_v39 }
 0x1d4   :  { %v518_v27 = vpop.f32.mrf.mxu0 }
 0x1d5   :  { %v551_v55 = vmax.f32 %v527_v44, 0.0  ;;  %v519_v56 = vadd.f32 %v518_v27, %v423_v53 }
 0x1d6   :  { %v763_v28 = vpop.f32.mrf.mxu0 }
 0x1d7   :  { %v530_v40 = vadd.f32 %v763_v28, %v438_v35  ;;  %v549_v60 = vmax.f32 %v519_v56, 0.0 }
 0x1d8   :  { %v521_v30 = vpop.f32.mrf.mxu0 }
 0x1d9   :  { %v552_v49 = vmax.f32 %v530_v40, 0.0  ;;  %v522_v50 = vadd.f32 %v521_v30, %v428_v48  ;;  %v700_v30 = vpop.permute.xlu0 %699 }
 0x1da   :  { %v766_v32 = vpop.f32.mrf.mxu0 }
 0x1db   :  { %v543_v34 = vadd.f32 %v766_v32, %v453_v26  ;;  %v562_v58 = vpack.c.bf16 %v552_v49, %v551_v55  ;;  %v550_v59 = vmax.f32 %v522_v50, 0.0  ;;  %v705_v32 = vrot.slane %v700_v30, %v150_v6 }
 0x1dc   :  { %v534_v33 = vpop.f32.mrf.mxu0 }
 0x1dd   :  { %v535_v37 = vadd.f32 %v534_v33, %v443_v31  ;;  %v555_v41 = vmax.f32 %v543_v34, 0.0  ;;  %v561_v61 = vpack.c.bf16 %v550_v59, %v549_v60 }
 0x1de   :  { %v767_v36 = vpop.f32.mrf.mxu0 }
 0x1df   :  { %v546_v38 = vadd.f32 %v767_v36, %v458_v54  ;;  %v553_v45 = vmax.f32 %v535_v37, 0.0 }
 0x1e0   :  { %v537_v57 = vpop.f32.mrf.mxu0 }
 0x1e1   :  { %v556_v42 = vmax.f32 %v546_v38, 0.0  ;;  %v538_v43 = vadd.f32 %v537_v57, %v448_v29 }
 0x1e3   :  { %v554_v46 = vmax.f32 %v538_v43, 0.0  ;;  %v564_v47 = vpack.c.bf16 %v556_v42, %v555_v41 }
 0x1e5   :  { %v563_v51 = vpack.c.bf16 %v554_v46, %v553_v45  ;;  %768 = vmatprep.subr.bf16.mxu1 %v564_v47 }
 0x1e6   :  { %769 = vmatpush3.bf16.msra.mxu1 %v564_v47 }
 0x1e7   :  { %770 = vmatprep.subr.bf16.mxu1 %v563_v51 }
 0x1ea   :  { %771 = vmatpush3.bf16.msra.mxu1 %v563_v51 }
 0x1eb   :  { %772 = vmatprep.subr.bf16.mxu1 %v562_v58 }
 0x1ee   :  { %773 = vmatpush3.bf16.msra.mxu1 %v562_v58 }
 0x1ef   :  { %774 = vmatprep.subr.bf16.mxu1 %v561_v61 }
 0x1f2   :  { %775 = vmatpush3.bf16.msra.mxu1 %v561_v61 }
 0x1f5   :  { %777 = vmatmul.mubr.msk.bf16.vlgmr.msra.gmra.mxu1 %vm599_vm2, %v805_v62 }
 0x2b5   :  { %v778_v52 = vpop.f32.mrf.mxu1 }
 0x2b6   :  { %v649_v10 = vadd.f32 %v778_v52, %v582_v4 }
 0x2b7   :  { %v640_v5 = vpop.f32.mrf.mxu1 }
 0x2b8   :  { %v641_v7 = vadd.f32 %v640_v5, %v572_v63  ;;  %v657_v18 = vmax.f32 %v649_v10, 0.0 }
 0x2b9   :  { %v779_v9 = vpop.f32.mrf.mxu1 }
 0x2ba   :  { %v655_v15 = vmax.f32 %v641_v7, 0.0  ;;  %v652_v16 = vadd.f32 %v779_v9, %v587_v2  ;;  %v685_v3 = vmul.f32 %v676_v23, %v657_v18 }
 0x2bb   :  { %v643_v14 = vpop.f32.mrf.mxu1 }
 0x2bc   :  { %v644_v17 = vadd.f32 %v643_v14, %v577_v1  ;;  %v683_v20 = vmul.f32 %v666_v11, %v655_v15  ;;  %v658_v21 = vmax.f32 %v652_v16, 0.0 }
 0x2be   :  { %v656_v19 = vmax.f32 %v644_v17, 0.0  ;;  %v686_v24 = vmul.f32 %v681_v13, %v658_v21 }
 0x2c0   :  { %v684_v22 = vmul.f32 %v671_v0, %v656_v19 }
 0x2c2   :  { %v687_v12 = vadd.f32 %v684_v22, %v683_v20 }
 0x2c4   :  { %v688_v54 = vadd.f32 %v687_v12, %v685_v3 }
 0x2c6   :  { %v689_v25 = vadd.f32 %v688_v54, %v686_v24 }
 0x2c8   :  { %v690_v26 = vrot.slane %v689_v25, 4 }
 0x2ca   :  { %v691_v27 = vadd.f32 %v690_v26, %v689_v25 }
 0x2cc   :  { %v692_v28 = vrot.slane %v691_v27, 2 }
 0x2ce   :  { %v693_v29 = vadd.f32 %v692_v28, %v691_v27 }
 0x2d0   :  { %v694_v31 = vrot.slane %v693_v29, 1 }
 0x2d2   :  { %v695_v33 = vadd.f32 %v694_v31, %v693_v29 }
 0x2d4   :  { %v706_v34 = vadd.f32 %v705_v32, %v695_v33 }
 0x2d6   :  { %v707_v35 = vsub.f32 0.0, %v706_v34 }
 0x2d8   :  { %v708_v36 = vmul.f32 1.442695, %v707_v35 }
 0x2da   :  { %806 = vpow2.f32 %v708_v36 }
 0x2e7   :  { %v807_v37 = vpop.eup %806 }
 0x2e8   :  { %v710_v38 = vadd.f32 1.0, %v807_v37 }
 0x2ea   :  { %808 = vrcp.f32 %v710_v38 }
 0x2f7   :  { %v809_v39 = vpop.eup %808 }
 0x2f8   :  { %713 = vst [vmem:[%s1142_s10] sm:$0x1] %v809_v39 }

</bundles_post_ra>
